<compile_context>
chip_gen: v7x
topology: tpu7x:2x2x1
jax: 0.10.0
libtpu: 0.0.40
codegen_flags: <defaults>
</compile_context>

<pallas_src>
import functools

import jax
import jax.numpy as jnp
import numpy as np
from jax.experimental import pallas as pl
from jax.experimental.pallas import tpu as pltpu


_HEAD_LANES = 128   # pad the 5-wide head output to a lane-dense 128-wide slab
_MAX_BPB = 32       # batch elements folded per grid step (~230 KiB VMEM per elem)


def _num_tensorcores():
    """Best-effort TensorCore-per-chip count (2 on megacore/v7x, else 1)."""
    try:
        info = pltpu.get_tpu_info()
        for attr in ("num_cores", "core_count", "num_tensorcores",
                     "tensorcore_count", "cores_per_chip", "num_cores_per_chip"):
            v = getattr(info, attr, None)
            if isinstance(v, int) and v > 0:
                return v
    except Exception:
        pass
    try:
        kind = jax.devices()[0].device_kind.lower()
    except Exception:
        return 1
    if any(tag in kind for tag in ("v4", "v5p", "v7", "7x")):
        return 2
    return 1


def _siamese_kernel(xp_ref, wbb_ref, zf_ref, wh_ref, out_ref):
    """One block of `bpb` folded batch elements per grid step.

    xp_ref : (1, bpb*HW, P)   bf16 search patches (P = 3*stride*stride)
    wbb_ref: (P, C)           bf16 backbone patchify-conv weight
    zf_ref : (1, bpb, C, NK)  bf16 template features, channels-major (no transpose)
    wh_ref : (NK, 128)        f32 head weight, zero-padded 5 -> 128 lanes
    out_ref: (1, bpb*HW, 128) bf16 lane-dense head output (cols 0..4 valid)
    """
    bpb = zf_ref.shape[1]
    rows = xp_ref.shape[1]
    hw = rows // bpb
    C = wbb_ref.shape[1]
    NK = zf_ref.shape[3]

    # backbone: patchify conv as one (bpb*HW, P) @ (P, C) matmul + ReLU.
    # bf16 x bf16 -> f32 MXU accumulation; keep the result in f32.
    xf = jnp.maximum(
        jnp.dot(xp_ref[0], wbb_ref[...], preferred_element_type=jnp.float32),
        0.0,
    )                                                      # (rows, C) f32

    # PW-Corr + ReLU as a single batched contraction over the folded batch.
    xf3 = xf.reshape(bpb, hw, C)                           # leading-dim split (free)
    zf3 = zf_ref[0].astype(jnp.float32)                    # (bpb, C, NK) tiny cast
    corr = jnp.maximum(
        jnp.einsum("bnc,bck->bnk", xf3, zf3,
                   preferred_element_type=jnp.float32),
        0.0,
    )                                                      # (bpb, HW, NK) f32

    # fused 1x1-conv cls+reg head, lane-dense 128-wide slab (unmasked stores).
    head = jnp.dot(corr.reshape(rows, NK), wh_ref[...],
                   preferred_element_type=jnp.float32)     # (rows, 128) f32
    out_ref[0] = head.astype(out_ref.dtype)                # bf16 slab write


class SuperModelMACsPallas:
    def __init__(self, search_size=128, template_size=64, stride=16,
                 channels=32, seed=0):
        self.search_size = search_size
        self.template_size = template_size
        self.stride = stride
        self.score_size = round(self.search_size / self.stride)
        self.num_kernel = round(self.template_size / self.stride) ** 2
        self.channels = channels

        k0, k1 = jax.random.split(jax.random.PRNGKey(seed))
        patch_dim = 3 * stride * stride
        # backbone patchify-conv weight, equivalent to torch conv weight
        # (C, 3, stride, stride) flattened and transposed.
        self.w_backbone = (
            0.02 * jax.random.normal(k0, (patch_dim, channels), jnp.float32)
        )
        # fused head weight: col 0 -> cls (1 ch), cols 1..4 -> reg (4 ch)
        self.w_head = (
            0.05 * jax.random.normal(k1, (self.num_kernel, 5), jnp.float32)
        )
        # zero-padded, lane-dense version for the kernel (unmasked vst stores)
        self.w_head_padded = (
            jnp.zeros((self.num_kernel, _HEAD_LANES), jnp.float32)
            .at[:, :5].set(self.w_head)
        )

    # ---------------------------------------------------------------- helpers
    def _extract_patches(self, search):
        """(B,3,S,S) NCHW -> (B, HW, 3*stride*stride), patch layout (c,kh,kw)."""
        B = search.shape[0]
        s, H = self.stride, self.score_size
        x = search.reshape(B, 3, H, s, H, s)              # (B,3,H,s,W,s)
        x = x.transpose(0, 2, 4, 1, 3, 5)                 # (B,H,W,3,s,s)
        return x.reshape(B, H * H, 3 * s * s)

    def _choose_num_blocks(self, B):
        """Grid size: >= num-TensorCores blocks so both cores of 2-TC chips
        (v4/v5p/v7x) get work; otherwise as few, as large, blocks as possible
        (each ~0.35us of per-step overhead), capped at _MAX_BPB elems/step."""
        min_blocks = min(B, max(1, _num_tensorcores()))
        blocks = max(min_blocks, -(-B // _MAX_BPB))
        blocks = min(blocks, B)
        while B % blocks != 0:          # smallest divisor of B >= blocks
            blocks += 1
        return blocks

    # ---------------------------------------------------------------- forward
    @functools.partial(jax.jit, static_argnums=0)
    def forward(self, zf, search):
        """zf: (B,C,t,t) template features (NCHW); search: (B,3,S,S) image (NCHW)."""
        B = search.shape[0]
        H = self.score_size
        NK, C = self.num_kernel, self.channels
        HW = H * H
        P = 3 * self.stride * self.stride

        blocks = self._choose_num_blocks(B)
        bpb = B // blocks
        rows = bpb * HW

        # bf16 at the pallas_call boundary halves dominant HBM traffic; cast
        # search BEFORE patch extraction so the XLA transpose pass is half-size.
        x_patches = self._extract_patches(search.astype(jnp.bfloat16))
        x_patches = x_patches.reshape(blocks, rows, P)            # (G, bpb*HW, P)
        # zf: NCHW already has channels leading -> plain reshape, no transpose.
        zf_blk = zf.astype(jnp.bfloat16).reshape(blocks, bpb, C, NK)
        w_bb = self.w_backbone.astype(jnp.bfloat16)
        w_hd = self.w_head_padded                                  # f32, tiny

        # real-work FLOPs (5-wide head, not the padded 128 lanes)
        flops = 2 * B * HW * (P * C + C * NK + NK * 5)
        bytes_accessed = (
            x_patches.size * x_patches.dtype.itemsize
            + w_bb.size * w_bb.dtype.itemsize
            + zf_blk.size * zf_blk.dtype.itemsize
            + w_hd.size * w_hd.dtype.itemsize
            + B * HW * _HEAD_LANES * 2          # bf16 output slab
        )

        # explicit VMEM budget: double-buffered blocks + weights (+ slack),
        # kept <= 32 MiB so it is valid on every chip incl. v7x (64 MiB phys).
        block_bytes = rows * P * 2 + bpb * C * NK * 2 + rows * _HEAD_LANES * 2
        weight_bytes = P * C * 2 + NK * _HEAD_LANES * 4
        vmem_limit = min(32 << 20, max(16 << 20,
                                       2 * (2 * block_bytes + 2 * weight_bytes)))

        out = pl.pallas_call(
            _siamese_kernel,
            out_shape=jax.ShapeDtypeStruct((blocks, rows, _HEAD_LANES),
                                           jnp.bfloat16),
            grid_spec=pltpu.PrefetchScalarGridSpec(
                num_scalar_prefetch=0,
                grid=(blocks,),
                in_specs=[
                    pl.BlockSpec((1, rows, P), lambda b: (b, 0, 0)),
                    # weights: grid-independent index_maps -> fetched once
                    pl.BlockSpec((P, C), lambda b: (0, 0)),
                    pl.BlockSpec((1, bpb, C, NK), lambda b: (b, 0, 0, 0)),
                    pl.BlockSpec((NK, _HEAD_LANES), lambda b: (0, 0)),
                ],
                out_specs=pl.BlockSpec((1, rows, _HEAD_LANES),
                                       lambda b: (b, 0, 0)),
            ),
            compiler_params=pltpu.CompilerParams(
                dimension_semantics=("parallel",),
                vmem_limit_bytes=int(vmem_limit)),
            cost_estimate=pl.CostEstimate(
                flops=flops, transcendentals=0, bytes_accessed=bytes_accessed),
        )(x_patches, w_bb, zf_blk, w_hd)

        # drop the zero padding, cast the tiny useful slice to f32, split into
        # NCHW cls / reg maps (PyTorch head convention)
        out = out.reshape(B, HW, _HEAD_LANES)[:, :, :5].astype(jnp.float32)
        cls = out[:, :, :1].reshape(B, H, H, 1).transpose(0, 3, 1, 2)  # (B,1,H,W)
        reg = out[:, :, 1:].reshape(B, H, H, 4).transpose(0, 3, 1, 2)  # (B,4,H,W)
        return {"cls": cls, "reg": reg}

    # -------------------------------------------------------------- reference
    def _forward_ref(self, zf, search):
        """Pure-JAX reference: bf16 input rounding only, f32 everywhere after."""
        B = search.shape[0]
        H = self.score_size
        NK, C = self.num_kernel, self.channels
        hi = jax.lax.Precision.HIGHEST
        xp = self._extract_patches(search.astype(jnp.bfloat16)).astype(jnp.float32)
        zf_f = zf.astype(jnp.bfloat16).astype(jnp.float32).reshape(B, C, NK)
        wbb = self.w_backbone.astype(jnp.bfloat16).astype(jnp.float32)
        whd = self.w_head
        xf = jnp.maximum(jnp.einsum("bnp,pc->bnc", xp, wbb, precision=hi), 0.0)
        corr = jnp.maximum(jnp.einsum("bnc,bck->bnk", xf, zf_f, precision=hi), 0.0)
        out = jnp.einsum("bnk,kf->bnf", corr, whd, precision=hi)
        cls = out[:, :, :1].reshape(B, H, H, 1).transpose(0, 3, 1, 2)
        reg = out[:, :, 1:].reshape(B, H, H, 4).transpose(0, 3, 1, 2)
        return {"cls": cls, "reg": reg}


if __name__ == "__main__":
    model = SuperModelMACsPallas(search_size=128, template_size=64,
                                 stride=16, channels=32, seed=0)

    B = 2
    t = round(model.template_size / model.stride)  # template feature side = 4
    key = jax.random.PRNGKey(0)
    k_zf, k_x = jax.random.split(key)
    # zf: template features already extracted (B, C, t, t); search: raw image.
    zf = jax.random.normal(k_zf, (B, model.channels, t, t), jnp.float32)
    search = jax.random.normal(k_x, (B, 3, model.search_size,
                                     model.search_size), jnp.float32)

    out = model.forward(zf, search)
    jax.block_until_ready(out)

    ref = model._forward_ref(zf, search)
    np.testing.assert_allclose(np.asarray(out["cls"]), np.asarray(ref["cls"]),
                               rtol=2e-2, atol=2e-2)
    np.testing.assert_allclose(np.asarray(out["reg"]), np.asarray(ref["reg"]),
                               rtol=2e-2, atol=2e-2)

    print("KERNEL_OK")
</pallas_src>

<mosaic_0001>
module attributes {stable_mosaic.version = 11 : i64} {
  func.func @_siamese_kernel(%arg0: i32, %arg1: memref<1x128x768xbf16, #tpu.memory_space<vmem>>, %arg2: memref<768x32xbf16, #tpu.memory_space<vmem>>, %arg3: memref<1x2x32x16xbf16, #tpu.memory_space<vmem>>, %arg4: memref<16x128xf32, #tpu.memory_space<vmem>>, %arg5: memref<1x128x128xbf16, #tpu.memory_space<vmem>>) attributes {dimension_semantics = [#tpu.dimension_semantics<parallel>], iteration_bounds = array<i64: 1>, scalar_prefetch = 0 : i64, scratch_operands = 0 : i64, tpu.core_type = #tpu.core_type<tc>, window_params = [{transform_indices = @transform_0, window_bounds = array<i64: 1, 128, 768>}, {pipeline_mode = #tpu.pipeline_mode<synchronous>, transform_indices = @transform_1, window_bounds = array<i64: 768, 32>}, {transform_indices = @transform_2, window_bounds = array<i64: 1, 2, 32, 16>}, {pipeline_mode = #tpu.pipeline_mode<synchronous>, transform_indices = @transform_3, window_bounds = array<i64: 16, 128>}, {transform_indices = @transform_4, window_bounds = array<i64: 1, 128, 128>}]} {
    %c0 = arith.constant 0 : index
    %c0_0 = arith.constant 0 : index
    %c0_1 = arith.constant 0 : index
    %0 = vector.load %arg1[%c0, %c0_0, %c0_1] : memref<1x128x768xbf16, #tpu.memory_space<vmem>>, vector<1x128x768xbf16>
    %1 = vector.shape_cast %0 : vector<1x128x768xbf16> to vector<128x768xbf16>
    %c0_2 = arith.constant 0 : index
    %c0_3 = arith.constant 0 : index
    %2 = vector.load %arg2[%c0_2, %c0_3] : memref<768x32xbf16, #tpu.memory_space<vmem>>, vector<768x32xbf16>
    %cst = arith.constant dense<0.000000e+00> : vector<128x32xf32>
    %3 = tpu.matmul %1, %2, %cst {dimension_numbers = #tpu.dot_dimension_numbers<[1], [0], [0], [1], [0, 0, 1, 1], [], []>} : vector<128x768xbf16>, vector<768x32xbf16>, vector<128x32xf32> -> vector<128x32xf32>
    %cst_4 = arith.constant 0.000000e+00 : f32
    %4 = vector.broadcast %cst_4 : f32 to vector<128x32xf32>
    %5 = arith.maximumf %3, %4 : vector<128x32xf32>
    %6 = vector.shape_cast %5 : vector<128x32xf32> to vector<2x64x32xf32>
    %c0_5 = arith.constant 0 : index
    %c0_6 = arith.constant 0 : index
    %c0_7 = arith.constant 0 : index
    %c0_8 = arith.constant 0 : index
    %7 = vector.load %arg3[%c0_5, %c0_6, %c0_7, %c0_8] : memref<1x2x32x16xbf16, #tpu.memory_space<vmem>>, vector<1x2x32x16xbf16>
    %8 = vector.shape_cast %7 : vector<1x2x32x16xbf16> to vector<2x32x16xbf16>
    %9 = arith.extf %8 : vector<2x32x16xbf16> to vector<2x32x16xf32>
    "tpu.trace_start"() <{level = 10 : i32, message = "bnc,bck->bnk"}> : () -> ()
    %cst_9 = arith.constant dense<0.000000e+00> : vector<2x64x16xf32>
    %10 = tpu.matmul %6, %9, %cst_9 {dimension_numbers = #tpu.dot_dimension_numbers<[2], [1], [1], [2], [0, 0, 0, 1, 1, 2], [0], [0]>} : vector<2x64x32xf32>, vector<2x32x16xf32>, vector<2x64x16xf32> -> vector<2x64x16xf32>
    "tpu.trace_stop"() : () -> ()
    %cst_10 = arith.constant 0.000000e+00 : f32
    %11 = vector.broadcast %cst_10 : f32 to vector<2x64x16xf32>
    %12 = arith.maximumf %10, %11 : vector<2x64x16xf32>
    %13 = vector.shape_cast %12 : vector<2x64x16xf32> to vector<128x16xf32>
    %c0_11 = arith.constant 0 : index
    %c0_12 = arith.constant 0 : index
    %14 = vector.load %arg4[%c0_11, %c0_12] : memref<16x128xf32, #tpu.memory_space<vmem>>, vector<16x128xf32>
    %cst_13 = arith.constant dense<0.000000e+00> : vector<128x128xf32>
    %15 = tpu.matmul %13, %14, %cst_13 {dimension_numbers = #tpu.dot_dimension_numbers<[1], [0], [0], [1], [0, 0, 1, 1], [], []>} : vector<128x16xf32>, vector<16x128xf32>, vector<128x128xf32> -> vector<128x128xf32>
    %16 = arith.truncf %15 : vector<128x128xf32> to vector<128x128xbf16>
    %c0_14 = arith.constant 0 : index
    %c0_15 = arith.constant 0 : index
    %c0_16 = arith.constant 0 : index
    %17 = vector.load %arg5[%c0_14, %c0_15, %c0_16] : memref<1x128x128xbf16, #tpu.memory_space<vmem>>, vector<1x128x128xbf16>
    %18 = vector.shape_cast %17 : vector<1x128x128xbf16> to vector<128x128xbf16>
    %19 = vector.shape_cast %16 : vector<128x128xbf16> to vector<1x128x128xbf16>
    tpu.vector_store %arg5[%c0_14, %c0_15, %c0_16], %19 {strides = array<i32>} : memref<1x128x128xbf16, #tpu.memory_space<vmem>>, vector<1x128x128xbf16>,
    return
  }
  func.func @transform_0(%arg0: i32) -> (i32, i32, i32) {
    %c0_i32 = arith.constant 0 : i32
    %c0_i32_0 = arith.constant 0 : i32
    %c0_i32_1 = arith.constant 0 : i32
    return %arg0, %c0_i32, %c0_i32_0 : i32, i32, i32
  }
  func.func @transform_1(%arg0: i32) -> (i32, i32) {
    %c0_i32 = arith.constant 0 : i32
    %c0_i32_0 = arith.constant 0 : i32
    %c0_i32_1 = arith.constant 0 : i32
    return %c0_i32, %c0_i32_0 : i32, i32
  }
  func.func @transform_2(%arg0: i32) -> (i32, i32, i32, i32) {
    %c0_i32 = arith.constant 0 : i32
    %c0_i32_0 = arith.constant 0 : i32
    %c0_i32_1 = arith.constant 0 : i32
    %c0_i32_2 = arith.constant 0 : i32
    return %arg0, %c0_i32, %c0_i32_0, %c0_i32_1 : i32, i32, i32, i32
  }
  func.func @transform_3(%arg0: i32) -> (i32, i32) {
    %c0_i32 = arith.constant 0 : i32
    %c0_i32_0 = arith.constant 0 : i32
    %c0_i32_1 = arith.constant 0 : i32
    return %c0_i32, %c0_i32_0 : i32, i32
  }
  func.func @transform_4(%arg0: i32) -> (i32, i32, i32) {
    %c0_i32 = arith.constant 0 : i32
    %c0_i32_0 = arith.constant 0 : i32
    %c0_i32_1 = arith.constant 0 : i32
    return %arg0, %c0_i32, %c0_i32_0 : i32, i32, i32
  }
}

</mosaic_0001>

<bundles_post_ra>
// kernel: forward.1
= control target key start
LH: loop header
LB: loop body
LE: loop exit
PB: predicated region body
PF: predicated region fallthrough
CT: control target
= control target key end

     0   :  { %vm1013_vm0 = vcmask 261120   ;;  %vm1290_vm1 = vcmask 130048   ;;  %s2675_s1 = inlined_call_operand.vmem [shape: bf16[768,32], index: 1, kind: input, shape index: {}]   ;;  %s2676_s0 = inlined_call_operand.vmem [shape: bf16[1,128,768], index: 0, kind: input, shape index: {}]   ;;  %s2677_s2 = inlined_call_operand.vmem [shape: bf16[1,2,32,16], index: 2, kind: input, shape index: {}]   ;;  %s2678_s3 = inlined_call_operand.vmem [shape: f32[16,128], index: 3, kind: input, shape index: {}]   ;;  %s2679_s4 = inlined_call_operand.vmem [shape: bf16[1,128,128], index: 4, kind: output, shape index: {}]  }
   0x1   :  { %v2116_v0 = vld [vmem:[%s2675_s1 + $0x40] sm:$0xff]   ;;  %v2120_v4 = vld [vmem:[%s2675_s1 + $0x48] sm:$0xff]   ;;  %v2124_v8 = vld [vmem:[%s2675_s1 + $0x50] sm:$0xff]  }
   0x2   :  { %v2117_v1 = vld [vmem:[%s2675_s1 + $0xc0] sm:$0xff]   ;;  %1794 = vmatprep.subr.bf16.mxu0 %v2116_v0  ;;  %v2121_v5 = vld [vmem:[%s2675_s1 + $0xc8] sm:$0xff]   ;;  %v2125_v9 = vld [vmem:[%s2675_s1 + $0xd0] sm:$0xff]  }
   0x3   :  { %v2118_v2 = vld [vmem:[%s2675_s1] sm:$0xff]   ;;  %1858 = vmatprep.subr.bf16.mxu1 %v2117_v1  ;;  %v2122_v6 = vld [vmem:[%s2675_s1 + $0x8] sm:$0xff]   ;;  %v2126_v10 = vld [vmem:[%s2675_s1 + $0x10] sm:$0xff]  }
   0x4   :  { %v2119_v3 = vld [vmem:[%s2675_s1 + $0x80] sm:$0xff]   ;;  %1795 = vmatpush3.bf16.msra.mxu0 %v2118_v2  ;;  %v2123_v7 = vld [vmem:[%s2675_s1 + $0x88] sm:$0xff]   ;;  %v2127_v11 = vld [vmem:[%s2675_s1 + $0x90] sm:$0xff]  }
   0x5   :  { %1859 = vmatpush3.bf16.msra.mxu1 %v2119_v3  ;;  %1796 = vmatprep.subr.bf16.mxu0 %v2120_v4  ;;  %v2128_v12 = vld [vmem:[%s2675_s1 + $0x58] sm:$0xff]   ;;  %v2132_v16 = vld [vmem:[%s2675_s1 + $0x60] sm:$0xff]   ;;  %v2136_v20 = vld [vmem:[%s2675_s1 + $0x68] sm:$0xff]  }
   0x6   :  { %1860 = vmatprep.subr.bf16.mxu1 %v2121_v5  ;;  %v2129_v13 = vld [vmem:[%s2675_s1 + $0xd8] sm:$0xff]   ;;  %v2133_v17 = vld [vmem:[%s2675_s1 + $0xe0] sm:$0xff]   ;;  %v2137_v21 = vld [vmem:[%s2675_s1 + $0xe8] sm:$0xff]  }
   0x7   :  { %v2130_v14 = vld [vmem:[%s2675_s1 + $0x18] sm:$0xff]   ;;  %v2134_v18 = vld [vmem:[%s2675_s1 + $0x20] sm:$0xff]   ;;  %v2138_v22 = vld [vmem:[%s2675_s1 + $0x28] sm:$0xff]  }
   0x8   :  { %1797 = vmatpush3.bf16.msra.mxu0 %v2122_v6  ;;  %v2131_v15 = vld [vmem:[%s2675_s1 + $0x98] sm:$0xff]   ;;  %v2135_v19 = vld [vmem:[%s2675_s1 + $0xa0] sm:$0xff]   ;;  %v2139_v23 = vld [vmem:[%s2675_s1 + $0xa8] sm:$0xff]  }
   0x9   :  { %1861 = vmatpush3.bf16.msra.mxu1 %v2123_v7  ;;  %1798 = vmatprep.subr.bf16.mxu0 %v2124_v8  ;;  %v2140_v24 = vld [vmem:[%s2675_s1 + $0x70] sm:$0xff]   ;;  %v2144_v28 = vld [vmem:[%s2675_s1 + $0x78] sm:$0xff]   ;;  %v2151_v34 = vld [vmem:[%s2676_s0 + $0x8] ss:$24 sps:$4 sm:$0xff]  }
   0xa   :  { %1862 = vmatprep.subr.bf16.mxu1 %v2125_v9  ;;  %v2141_v25 = vld [vmem:[%s2675_s1 + $0xf0] sm:$0xff]   ;;  %v2145_v29 = vld [vmem:[%s2675_s1 + $0xf8] sm:$0xff]   ;;  %v2153_v35 = vld [vmem:[%s2676_s0 + $0xc] ss:$24 sps:$4 sm:$0xff]  }
   0xb   :  { %v2142_v26 = vld [vmem:[%s2675_s1 + $0x30] sm:$0xff]   ;;  %v2146_v30 = vld [vmem:[%s2675_s1 + $0x38] sm:$0xff]   ;;  %v2154_v36 = vld [vmem:[%s2675_s1 + $0x140] sm:$0xff]   ;;  %819 = vmatprep.mubr.bf16.mxu1 %v2153_v35 }
   0xc   :  { %1799 = vmatpush3.bf16.msra.mxu0 %v2126_v10  ;;  %v2143_v27 = vld [vmem:[%s2675_s1 + $0xb0] sm:$0xff]   ;;  %v2147_v31 = vld [vmem:[%s2675_s1 + $0xb8] sm:$0xff]   ;;  %v2155_v37 = vld [vmem:[%s2675_s1 + $0x100] sm:$0xff]  }
   0xd   :  { %1863 = vmatpush3.bf16.msra.mxu1 %v2127_v11  ;;  %1800 = vmatprep.subr.bf16.mxu0 %v2128_v12  ;;  %v2148_v32 = vld [vmem:[%s2676_s0] ss:$24 sps:$4 sm:$0xff]   ;;  %v2150_v33 = vld [vmem:[%s2676_s0 + $0x4] ss:$24 sps:$4 sm:$0xff]   ;;  %v2156_v38 = vld [vmem:[%s2676_s0 + $0x34] ss:$24 sps:$4 sm:$0xff]  }
   0xe   :  { %1864 = vmatprep.subr.bf16.mxu1 %v2129_v13  ;;  %722 = vmatprep.mubr.bf16.mxu0 %v2150_v33  ;;  %v2158_v39 = vld [vmem:[%s2676_s0 + $0x3c] ss:$24 sps:$4 sm:$0xff]   ;;  %v2160_v40 = vld [vmem:[%s2676_s0 + $0x30] ss:$24 sps:$4 sm:$0xff]   ;;  %v2166_v45 = vld [vmem:[%s2676_s0 + $0x6c] ss:$24 sps:$4 sm:$0xff]  }
   0xf   :  { %v2161_v41 = vld [vmem:[%s2676_s0 + $0x38] ss:$24 sps:$4 sm:$0xff]   ;;  %v2162_v42 = vld [vmem:[%s2675_s1 + $0x148] sm:$0xff]   ;;  %v2164_v44 = vld [vmem:[%s2676_s0 + $0x64] ss:$24 sps:$4 sm:$0xff]  }
  0x10   :  { %1801 = vmatpush3.bf16.msra.mxu0 %v2130_v14  ;;  %v2163_v43 = vld [vmem:[%s2675_s1 + $0x108] sm:$0xff]   ;;  %v2170_v46 = vld [vmem:[%s2675_s1 + $0x150] sm:$0xff]   ;;  %v2168_v48 = vld [vmem:[%s2676_s0 + $0x60] ss:$24 sps:$4 sm:$0xff]  }
  0x11   :  { %1865 = vmatpush3.bf16.msra.mxu1 %v2131_v15  ;;  %1802 = vmatprep.subr.bf16.mxu0 %v2132_v16  ;;  %v2171_v47 = vld [vmem:[%s2675_s1 + $0x110] sm:$0xff]   ;;  %v2169_v49 = vld [vmem:[%s2676_s0 + $0x68] ss:$24 sps:$4 sm:$0xff]   ;;  %v2178_v52 = vld [vmem:[%s2675_s1 + $0x158] sm:$0xff]  }
  0x12   :  { %1866 = vmatprep.subr.bf16.mxu1 %v2133_v17  ;;  %v2172_v50 = vld [vmem:[%s2676_s0 + $0x94] ss:$24 sps:$4 sm:$0xff]   ;;  %v2179_v53 = vld [vmem:[%s2675_s1 + $0x118] sm:$0xff]   ;;  %v2186_v54 = vld [vmem:[%s2675_s1 + $0x160] sm:$0xff]  }
  0x13   :  { %v2174_v51 = vld [vmem:[%s2676_s0 + $0x9c] ss:$24 sps:$4 sm:$0xff]   ;;  %v2187_v55 = vld [vmem:[%s2675_s1 + $0x120] sm:$0xff]   ;;  %v2176_v56 = vld [vmem:[%s2676_s0 + $0x90] ss:$24 sps:$4 sm:$0xff]  }
  0x14   :  { %1803 = vmatpush3.bf16.msra.mxu0 %v2134_v18  ;;  %v2177_v57 = vld [vmem:[%s2676_s0 + $0x98] ss:$24 sps:$4 sm:$0xff]   ;;  %v2180_v58 = vld [vmem:[%s2676_s0 + $0xc4] ss:$24 sps:$4 sm:$0xff]   ;;  %v2194_v60 = vld [vmem:[%s2675_s1 + $0x168] sm:$0xff]  }
  0x15   :  { %1867 = vmatpush3.bf16.msra.mxu1 %v2135_v19  ;;  %1804 = vmatprep.subr.bf16.mxu0 %v2136_v20  ;;  %v2182_v59 = vld [vmem:[%s2676_s0 + $0xcc] ss:$24 sps:$4 sm:$0xff]   ;;  %v2184_v62 = vld [vmem:[%s2676_s0 + $0xc0] ss:$24 sps:$4 sm:$0xff]   ;;  %v2202_v0 = vld [vmem:[%s2675_s1 + $0x170] sm:$0xff]  }
  0x16   :  { %1868 = vmatprep.subr.bf16.mxu1 %v2137_v21  ;;  %v2195_v61 = vld [vmem:[%s2675_s1 + $0x128] sm:$0xff]   ;;  %v2203_v1 = vld [vmem:[%s2675_s1 + $0x130] sm:$0xff]   ;;  %v2210_v4 = vld [vmem:[%s2675_s1 + $0x178] sm:$0xff]  }
  0x17   :  { %v2185_v63 = vld [vmem:[%s2676_s0 + $0xc8] ss:$24 sps:$4 sm:$0xff]   ;;  %v2188_v2 = vld [vmem:[%s2676_s0 + $0xf4] ss:$24 sps:$4 sm:$0xff]   ;;  %v2211_v5 = vld [vmem:[%s2675_s1 + $0x138] sm:$0xff]  }
  0x18   :  { %1805 = vmatpush3.bf16.msra.mxu0 %v2138_v22  ;;  %v2190_v3 = vld [vmem:[%s2676_s0 + $0xfc] ss:$24 sps:$4 sm:$0xff]   ;;  %v2192_v6 = vld [vmem:[%s2676_s0 + $0xf0] ss:$24 sps:$4 sm:$0xff]   ;;  %v2198_v9 = vld [vmem:[%s2676_s0 + $0x12c] ss:$24 sps:$4 sm:$0xff]  }
  0x19   :  { %1869 = vmatpush3.bf16.msra.mxu1 %v2139_v23  ;;  %1806 = vmatprep.subr.bf16.mxu0 %v2140_v24  ;;  %v2193_v7 = vld [vmem:[%s2676_s0 + $0xf8] ss:$24 sps:$4 sm:$0xff]   ;;  %v2196_v8 = vld [vmem:[%s2676_s0 + $0x124] ss:$24 sps:$4 sm:$0xff]   ;;  %v2201_v11 = vld [vmem:[%s2676_s0 + $0x128] ss:$24 sps:$4 sm:$0xff]  }
  0x1a   :  { %1870 = vmatprep.subr.bf16.mxu1 %v2141_v25  ;;  %v2200_v10 = vld [vmem:[%s2676_s0 + $0x120] ss:$24 sps:$4 sm:$0xff]   ;;  %v2204_v12 = vld [vmem:[%s2676_s0 + $0x154] ss:$24 sps:$4 sm:$0xff]   ;;  %v2208_v14 = vld [vmem:[%s2676_s0 + $0x150] ss:$24 sps:$4 sm:$0xff]  }
  0x1b   :  { %v2206_v13 = vld [vmem:[%s2676_s0 + $0x15c] ss:$24 sps:$4 sm:$0xff]   ;;  %v2209_v15 = vld [vmem:[%s2676_s0 + $0x158] ss:$24 sps:$4 sm:$0xff]   ;;  %v1784_v33 = vld [vmem:[%s2677_s2 + $0x8] sm:$0xff]  }
  0x1c   :  { %1807 = vmatpush3.bf16.msra.mxu0 %v2142_v26  ;;  %v2214_v16 = vld [vmem:[%s2676_s0 + $0x14] ss:$24 sps:$4 sm:$0xff]   ;;  %v2212_v17 = vld [vmem:[%s2676_s0 + $0x10] ss:$24 sps:$4 sm:$0xff]   ;;  %v2215_v18 = vld [vmem:[%s2676_s0 + $0x44] ss:$24 sps:$4 sm:$0xff]  }
  0x1d   :  { %1871 = vmatpush3.bf16.msra.mxu1 %v2143_v27  ;;  %1808 = vmatprep.subr.bf16.mxu0 %v2144_v28  ;;  %v2217_v19 = vld [vmem:[%s2676_s0 + $0x40] ss:$24 sps:$4 sm:$0xff]   ;;  %v2218_v20 = vld [vmem:[%s2676_s0 + $0x74] ss:$24 sps:$4 sm:$0xff]   ;;  %v2220_v21 = vld [vmem:[%s2676_s0 + $0x70] ss:$24 sps:$4 sm:$0xff]  }
  0x1e   :  { %1872 = vmatprep.subr.bf16.mxu1 %v2145_v29  ;;  %v2221_v22 = vld [vmem:[%s2676_s0 + $0xa4] ss:$24 sps:$4 sm:$0xff]   ;;  %v2223_v23 = vld [vmem:[%s2676_s0 + $0xa0] ss:$24 sps:$4 sm:$0xff]   ;;  %v2224_v24 = vld [vmem:[%s2676_s0 + $0xd4] ss:$24 sps:$4 sm:$0xff]  }
  0x1f   :  { %v2226_v25 = vld [vmem:[%s2676_s0 + $0xd0] ss:$24 sps:$4 sm:$0xff]   ;;  %v2227_v26 = vld [vmem:[%s2676_s0 + $0x104] ss:$24 sps:$4 sm:$0xff]   ;;  %v2229_v27 = vld [vmem:[%s2676_s0 + $0x100] ss:$24 sps:$4 sm:$0xff]  }
  0x20   :  { %1809 = vmatpush3.bf16.msra.mxu0 %v2146_v30  ;;  %v2230_v28 = vld [vmem:[%s2676_s0 + $0x134] ss:$24 sps:$4 sm:$0xff]   ;;  %v2232_v29 = vld [vmem:[%s2676_s0 + $0x130] ss:$24 sps:$4 sm:$0xff]   ;;  %v2233_v30 = vld [vmem:[%s2676_s0 + $0x164] ss:$24 sps:$4 sm:$0xff]  }
  0x21   :  { %1873 = vmatpush3.bf16.msra.mxu1 %v2147_v31  ;;  %1922 = vmatprep.subr.bf16.mxu0 %v2154_v36  ;;  %v2235_v31 = vld [vmem:[%s2676_s0 + $0x160] ss:$24 sps:$4 sm:$0xff]  }
  0x23   :  { %723 = vmatmul.mubr.bf16.vlgmr.msra.gmra.mrb[0].mxu0 %v2148_v32  ;;  %v1729_v32 = vld [vmem:[%s2677_s2] sm:$0xff]  }
  0x24   :  { %820 = vmatmul.mubr.bf16.vlgmr.msra.gmra.mrb[0].mxu1 %v2151_v34  ;;  %1923 = vmatpush3.bf16.msra.mxu0 %v2155_v37  ;;  %v2558_v34 = vld [vmem:[%s2677_s2 + $0x10] sm:$0xff]  }
  0x25   :  { %730 = vmatprep.mubr.bf16.mxu0 %v2156_v38  ;;  %827 = vmatprep.mubr.bf16.mxu1 %v2158_v39 }
  0x26   :  { %1924 = vmatprep.subr.bf16.mxu0 %v2162_v42  ;;  %2097 = vmatprep.subr.bf16.mxu1 %v1729_v32 }
  0x27   :  { %2099 = vmatpush3.bf16.msra.mxu1 %v1729_v32 }
  0x28   :  { %1925 = vmatpush3.bf16.msra.mxu0 %v2163_v43  ;;  %2101 = vmatprep.subr.bf16.mxu1 %v1784_v33 }
  0x29   :  { %1926 = vmatprep.subr.bf16.mxu0 %v2170_v46 }
  0x2b   :  { %731 = vmatmul.mubr.bf16.gmra.mrb[4].mxu0 %v2160_v40  ;;  %2103 = vmatpush3.bf16.msra.mxu1 %v1784_v33 }
  0x2c   :  { %828 = vmatmul.mubr.bf16.gmra.mrb[4].mxu1 %v2161_v41  ;;  %738 = vmatprep.mubr.bf16.mxu0 %v2164_v44 }
  0x2d   :  { %835 = vmatprep.mubr.bf16.mxu1 %v2166_v45  ;;  %1927 = vmatpush3.bf16.msra.mxu0 %v2171_v47 }
  0x2e   :  { %1928 = vmatprep.subr.bf16.mxu0 %v2178_v52  ;;  %2105 = vmatprep.subr.bf16.mxu1 %v2558_v34 }
  0x31   :  { %1929 = vmatpush3.bf16.msra.mxu0 %v2179_v53 }
  0x32   :  { %1930 = vmatprep.subr.bf16.mxu0 %v2186_v54 }
  0x33   :  { %739 = vmatmul.mubr.bf16.gmra.mrb[8].mxu0 %v2168_v48 }
  0x34   :  { %836 = vmatmul.mubr.bf16.gmra.mrb[8].mxu1 %v2169_v49  ;;  %746 = vmatprep.mubr.bf16.mxu0 %v2172_v50 }
  0x35   :  { %843 = vmatprep.mubr.bf16.mxu1 %v2174_v51  ;;  %1931 = vmatpush3.bf16.msra.mxu0 %v2187_v55 }
  0x36   :  { %1932 = vmatprep.subr.bf16.mxu0 %v2194_v60 }
  0x39   :  { %1933 = vmatpush3.bf16.msra.mxu0 %v2195_v61 }
  0x3a   :  { %1934 = vmatprep.subr.bf16.mxu0 %v2202_v0 }
  0x3b   :  { %747 = vmatmul.mubr.bf16.gmra.mrb[12].mxu0 %v2176_v56 }
  0x3c   :  { %844 = vmatmul.mubr.bf16.gmra.mrb[12].mxu1 %v2177_v57  ;;  %754 = vmatprep.mubr.bf16.mxu0 %v2180_v58 }
  0x3d   :  { %851 = vmatprep.mubr.bf16.mxu1 %v2182_v59  ;;  %1935 = vmatpush3.bf16.msra.mxu0 %v2203_v1 }
  0x3e   :  { %1936 = vmatprep.subr.bf16.mxu0 %v2210_v4 }
  0x41   :  { %1937 = vmatpush3.bf16.msra.mxu0 %v2211_v5 }
  0x43   :  { %755 = vmatmul.mubr.bf16.gmra.mrb[16].mxu0 %v2184_v62 }
  0x44   :  { %852 = vmatmul.mubr.bf16.gmra.mrb[16].mxu1 %v2185_v63  ;;  %762 = vmatprep.mubr.bf16.mxu0 %v2188_v2 }
  0x45   :  { %859 = vmatprep.mubr.bf16.mxu1 %v2190_v3 }
  0x4b   :  { %763 = vmatmul.mubr.bf16.gmra.mrb[20].mxu0 %v2192_v6 }
  0x4c   :  { %860 = vmatmul.mubr.bf16.gmra.mrb[20].mxu1 %v2193_v7  ;;  %770 = vmatprep.mubr.bf16.mxu0 %v2196_v8 }
  0x4d   :  { %867 = vmatprep.mubr.bf16.mxu1 %v2198_v9 }
  0x53   :  { %771 = vmatmul.mubr.bf16.gmra.mrb[24].mxu0 %v2200_v10 }
  0x54   :  { %868 = vmatmul.mubr.bf16.gmra.mrb[24].mxu1 %v2201_v11  ;;  %778 = vmatprep.mubr.bf16.mxu0 %v2204_v12 }
  0x55   :  { %875 = vmatprep.mubr.bf16.mxu1 %v2206_v13 }
  0x5b   :  { %779 = vmatmul.mubr.bf16.gmra.mrb[28].mxu0 %v2208_v14 }
  0x5c   :  { %876 = vmatmul.mubr.bf16.gmra.mrb[28].mxu1 %v2209_v15  ;;  %916 = vmatprep.mubr.bf16.mxu0 %v2214_v16 }
  0x63   :  { %917 = vmatmul.mubr.bf16.vlgmr.msra.gmra.mrb[32].mxu0 %v2212_v17 }
  0x64   :  { %924 = vmatprep.mubr.bf16.mxu0 %v2215_v18 }
  0x6b   :  { %925 = vmatmul.mubr.bf16.gmra.mrb[36].mxu0 %v2217_v19 }
  0x6c   :  { %932 = vmatprep.mubr.bf16.mxu0 %v2218_v20 }
  0x73   :  { %933 = vmatmul.mubr.bf16.gmra.mrb[40].mxu0 %v2220_v21 }
  0x74   :  { %940 = vmatprep.mubr.bf16.mxu0 %v2221_v22 }
  0x7b   :  { %941 = vmatmul.mubr.bf16.gmra.mrb[44].mxu0 %v2223_v23 }
  0x7c   :  { %948 = vmatprep.mubr.bf16.mxu0 %v2224_v24 }
  0x83   :  { %949 = vmatmul.mubr.bf16.gmra.mrb[48].mxu0 %v2226_v25 }
  0x84   :  { %956 = vmatprep.mubr.bf16.mxu0 %v2227_v26 }
  0x8b   :  { %957 = vmatmul.mubr.bf16.gmra.mrb[52].mxu0 %v2229_v27 }
  0x8c   :  { %964 = vmatprep.mubr.bf16.mxu0 %v2230_v28 }
  0x93   :  { %965 = vmatmul.mubr.bf16.gmra.mrb[56].mxu0 %v2232_v29 }
  0x94   :  { %972 = vmatprep.mubr.bf16.mxu0 %v2233_v30 }
  0x9b   :  { %973 = vmatmul.mubr.bf16.gmra.mrb[60].mxu0 %v2235_v31 }
  0xf6   :  { %v1810_v35 = vpop.f32.mrb[0].mxu0 }
  0xf7   :  { %v1874_v36 = vpop.f32.mrb[0].mxu1  ;;  %v1811_v37 = vpop.f32.mrb[1].mxu0 }
  0xf8   :  { %v1812_v38 = vadd.f32 %v1811_v37, %v1810_v35  ;;  %v1875_v39 = vpop.f32.mrb[1].mxu1  ;;  %v1813_v40 = vpop.f32.mrb[2].mxu0 }
  0xf9   :  { %v1876_v41 = vadd.f32 %v1875_v39, %v1874_v36  ;;  %v1877_v42 = vpop.f32.mrb[2].mxu1  ;;  %v1814_v43 = vpop.f32.mrb[3].mxu0 }
  0xfa   :  { %v1815_v44 = vadd.f32 %v1814_v43, %v1813_v40  ;;  %v1878_v45 = vpop.f32.mrb[3].mxu1 }
  0xfb   :  { %v2561_v46 = vadd.f32 %v1876_v41, %v1812_v38  ;;  %v1879_v47 = vadd.f32 %v1878_v45, %v1877_v42 }
  0xfd   :  { %v2563_v48 = vadd.f32 %v1879_v47, %v1815_v44 }
  0xfe   :  { %v1816_v49 = vpop.f32.mrb[4].mxu0 }
  0xff   :  { %v1880_v50 = vpop.f32.mrb[4].mxu1  ;;  %v1817_v51 = vpop.f32.mrb[5].mxu0 }
 0x100   :  { %v1818_v52 = vadd.f32 %v1817_v51, %v1816_v49  ;;  %v1881_v53 = vpop.f32.mrb[5].mxu1  ;;  %v1819_v54 = vpop.f32.mrb[6].mxu0 }
 0x101   :  { %v1882_v55 = vadd.f32 %v1881_v53, %v1880_v50  ;;  %v1883_v56 = vpop.f32.mrb[6].mxu1  ;;  %v1820_v57 = vpop.f32.mrb[7].mxu0 }
 0x102   :  { %v1821_v58 = vadd.f32 %v1820_v57, %v1819_v54  ;;  %v1884_v59 = vpop.f32.mrb[7].mxu1 }
 0x103   :  { %v2565_v60 = vadd.f32 %v1882_v55, %v1818_v52  ;;  %v1885_v61 = vadd.f32 %v1884_v59, %v1883_v56 }
 0x105   :  { %v2567_v62 = vadd.f32 %v1885_v61, %v1821_v58 }
 0x106   :  { %v1822_v63 = vpop.f32.mrb[8].mxu0 }
 0x107   :  { %v1886_v0 = vpop.f32.mrb[8].mxu1  ;;  %v1823_v1 = vpop.f32.mrb[9].mxu0 }
 0x108   :  { %v1824_v2 = vadd.f32 %v1823_v1, %v1822_v63  ;;  %v1887_v3 = vpop.f32.mrb[9].mxu1  ;;  %v1825_v4 = vpop.f32.mrb[10].mxu0 }
 0x109   :  { %v1888_v5 = vadd.f32 %v1887_v3, %v1886_v0  ;;  %v1889_v6 = vpop.f32.mrb[10].mxu1  ;;  %v1826_v7 = vpop.f32.mrb[11].mxu0 }
 0x10a   :  { %v1827_v8 = vadd.f32 %v1826_v7, %v1825_v4  ;;  %v1890_v9 = vpop.f32.mrb[11].mxu1 }
 0x10b   :  { %v2569_v10 = vadd.f32 %v1888_v5, %v1824_v2  ;;  %v1891_v11 = vadd.f32 %v1890_v9, %v1889_v6 }
 0x10d   :  { %v2571_v12 = vadd.f32 %v1891_v11, %v1827_v8 }
 0x10e   :  { %v1828_v13 = vpop.f32.mrb[12].mxu0 }
 0x10f   :  { %v1892_v14 = vpop.f32.mrb[12].mxu1  ;;  %v1829_v15 = vpop.f32.mrb[13].mxu0 }
 0x110   :  { %v1830_v16 = vadd.f32 %v1829_v15, %v1828_v13  ;;  %v1893_v17 = vpop.f32.mrb[13].mxu1  ;;  %v1831_v18 = vpop.f32.mrb[14].mxu0 }
 0x111   :  { %v1894_v19 = vadd.f32 %v1893_v17, %v1892_v14  ;;  %v1895_v20 = vpop.f32.mrb[14].mxu1  ;;  %v1832_v21 = vpop.f32.mrb[15].mxu0 }
 0x112   :  { %v1833_v22 = vadd.f32 %v1832_v21, %v1831_v18  ;;  %v1896_v23 = vpop.f32.mrb[15].mxu1 }
 0x113   :  { %v2573_v24 = vadd.f32 %v1894_v19, %v1830_v16  ;;  %v1897_v25 = vadd.f32 %v1896_v23, %v1895_v20 }
 0x115   :  { %v2575_v26 = vadd.f32 %v1897_v25, %v1833_v22 }
 0x116   :  { %v1834_v27 = vpop.f32.mrb[16].mxu0 }
 0x117   :  { %v1898_v28 = vpop.f32.mrb[16].mxu1  ;;  %v1835_v29 = vpop.f32.mrb[17].mxu0 }
 0x118   :  { %v1836_v30 = vadd.f32 %v1835_v29, %v1834_v27  ;;  %v1899_v31 = vpop.f32.mrb[17].mxu1  ;;  %v1837_v32 = vpop.f32.mrb[18].mxu0 }
 0x119   :  { %v1900_v33 = vadd.f32 %v1899_v31, %v1898_v28  ;;  %v1901_v35 = vpop.f32.mrb[18].mxu1  ;;  %v1838_v36 = vpop.f32.mrb[19].mxu0 }
 0x11a   :  { %v1839_v37 = vadd.f32 %v1838_v36, %v1837_v32  ;;  %v1902_v38 = vpop.f32.mrb[19].mxu1 }
 0x11b   :  { %v2577_v39 = vadd.f32 %v1900_v33, %v1836_v30  ;;  %v1903_v40 = vadd.f32 %v1902_v38, %v1901_v35 }
 0x11d   :  { %v2579_v41 = vadd.f32 %v1903_v40, %v1839_v37 }
 0x11e   :  { %v1840_v42 = vpop.f32.mrb[20].mxu0 }
 0x11f   :  { %v1904_v43 = vpop.f32.mrb[20].mxu1  ;;  %v1841_v44 = vpop.f32.mrb[21].mxu0 }
 0x120   :  { %v1842_v45 = vadd.f32 %v1841_v44, %v1840_v42  ;;  %v1905_v47 = vpop.f32.mrb[21].mxu1  ;;  %v1843_v49 = vpop.f32.mrb[22].mxu0 }
 0x121   :  { %v1906_v50 = vadd.f32 %v1905_v47, %v1904_v43  ;;  %v1907_v51 = vpop.f32.mrb[22].mxu1  ;;  %v1844_v52 = vpop.f32.mrb[23].mxu0  ;;  %v1786_v43 = vld [vmem:[%s2677_s2 + $0x18] sm:$0xff]  }
 0x122   :  { %v1845_v53 = vadd.f32 %v1844_v52, %v1843_v49  ;;  %v1908_v54 = vpop.f32.mrb[23].mxu1 }
 0x123   :  { %v2581_v55 = vadd.f32 %v1906_v50, %v1842_v45  ;;  %v1909_v56 = vadd.f32 %v1908_v54, %v1907_v51 }
 0x125   :  { %v2583_v57 = vadd.f32 %v1909_v56, %v1845_v53 }
 0x126   :  { %v1846_v58 = vpop.f32.mrb[24].mxu0 }
 0x127   :  { %v1910_v59 = vpop.f32.mrb[24].mxu1  ;;  %v1847_v61 = vpop.f32.mrb[25].mxu0 }
 0x128   :  { %v1848_v63 = vadd.f32 %v1847_v61, %v1846_v58  ;;  %v1911_v0 = vpop.f32.mrb[25].mxu1  ;;  %v1849_v1 = vpop.f32.mrb[26].mxu0 }
 0x129   :  { %v1912_v2 = vadd.f32 %v1911_v0, %v1910_v59  ;;  %v1913_v3 = vpop.f32.mrb[26].mxu1  ;;  %v1850_v4 = vpop.f32.mrb[27].mxu0 }
 0x12a   :  { %v1851_v5 = vadd.f32 %v1850_v4, %v1849_v1  ;;  %v1914_v6 = vpop.f32.mrb[27].mxu1 }
 0x12b   :  { %v2585_v7 = vadd.f32 %v1912_v2, %v1848_v63  ;;  %v1915_v8 = vadd.f32 %v1914_v6, %v1913_v3 }
 0x12d   :  { %v2587_v9 = vadd.f32 %v1915_v8, %v1851_v5 }
 0x12e   :  { %v1852_v11 = vpop.f32.mrb[28].mxu0 }
 0x12f   :  { %v1916_v13 = vpop.f32.mrb[28].mxu1  ;;  %v1853_v14 = vpop.f32.mrb[29].mxu0 }
 0x130   :  { %v1854_v15 = vadd.f32 %v1853_v14, %v1852_v11  ;;  %v1917_v16 = vpop.f32.mrb[29].mxu1  ;;  %v1855_v17 = vpop.f32.mrb[30].mxu0 }
 0x131   :  { %v1918_v18 = vadd.f32 %v1917_v16, %v1916_v13  ;;  %v1919_v19 = vpop.f32.mrb[30].mxu1  ;;  %v1856_v20 = vpop.f32.mrb[31].mxu0 }
 0x132   :  { %v1857_v21 = vadd.f32 %v1856_v20, %v1855_v17  ;;  %v1920_v22 = vpop.f32.mrb[31].mxu1 }
 0x133   :  { %v2589_v23 = vadd.f32 %v1918_v18, %v1854_v15  ;;  %v1921_v25 = vadd.f32 %v1920_v22, %v1919_v19 }
 0x135   :  { %v2591_v27 = vadd.f32 %v1921_v25, %v1857_v21 }
 0x136   :  { %v1938_v28 = vpop.f32.mrb[32].mxu0 }
 0x137   :  { %v1939_v29 = vpop.f32.mrb[33].mxu0 }
 0x138   :  { %v1940_v30 = vadd.f32 %v1939_v29, %v1938_v28  ;;  %v1941_v31 = vpop.f32.mrb[34].mxu0 }
 0x139   :  { %v1942_v32 = vpop.f32.mrb[35].mxu0 }
 0x13a   :  { %v919_v33 = vadd.f32 %v1940_v30, %v2561_v46  ;;  %v1943_v35 = vadd.f32 %v1942_v32, %v1941_v31 }
 0x13c   :  { %v981_v36 = vmax.f32 %v919_v33, 0.0  ;;  %v922_v37 = vadd.f32 %v1943_v35, %v2563_v48 }
 0x13e   :  { %v982_v38 = vmax.f32 %v922_v37, 0.0  ;;  %v1944_v40 = vpop.f32.mrb[36].mxu0  ;;  %2036 = vmatprep.mubr.msk.f32.mxu1 %vm1013_vm0, %v981_v36 }
 0x13f   :  { %v1945_v42 = vpop.f32.mrb[37].mxu0 }
 0x140   :  { %v1946_v44 = vadd.f32 %v1945_v42, %v1944_v40  ;;  %v1947_v45 = vpop.f32.mrb[38].mxu0  ;;  %2037 = vmatmul.mubr.msk.f32.vlgmr.msra.gmra.mrb[32].mxu1 %vm1013_vm0, %v982_v38 }
 0x141   :  { %v1948_v47 = vpop.f32.mrb[39].mxu0  ;;  %2107 = vmatpush3.bf16.msra.mxu1 %v2558_v34 }
 0x142   :  { %v927_v46 = vadd.f32 %v1946_v44, %v2565_v60  ;;  %v1949_v49 = vadd.f32 %v1948_v47, %v1947_v45  ;;  %2109 = vmatprep.subr.bf16.mxu1 %v1786_v43 }
 0x144   :  { %v983_v48 = vmax.f32 %v927_v46, 0.0  ;;  %v930_v50 = vadd.f32 %v1949_v49, %v2567_v62 }
 0x145   :  { %2111 = vmatpush3.bf16.msra.mxu1 %v1786_v43 }
 0x146   :  { %v984_v51 = vmax.f32 %v930_v50, 0.0  ;;  %v1950_v52 = vpop.f32.mrb[40].mxu0  ;;  %2039 = vmatprep.mubr.msk.f32.mxu1 %vm1013_vm0, %v983_v48 }
 0x147   :  { %v1951_v53 = vpop.f32.mrb[41].mxu0 }
 0x148   :  { %v1952_v54 = vadd.f32 %v1951_v53, %v1950_v52  ;;  %v1953_v56 = vpop.f32.mrb[42].mxu0  ;;  %2040 = vmatmul.mubr.msk.f32.gmra.mrb[34].mxu1 %vm1013_vm0, %v984_v51  ;;  %v1289_v51 = vld [vmem:[%s2678_s3 + $0x8] sm:$0xff] }
 0x149   :  { %v1954_v58 = vpop.f32.mrb[43].mxu0 }
 0x14a   :  { %v935_v34 = vadd.f32 %v1952_v54, %v2569_v10  ;;  %v1955_v59 = vadd.f32 %v1954_v58, %v1953_v56 }
 0x14c   :  { %v985_v60 = vmax.f32 %v935_v34, 0.0  ;;  %v938_v61 = vadd.f32 %v1955_v59, %v2571_v12 }
 0x14e   :  { %v986_v63 = vmax.f32 %v938_v61, 0.0  ;;  %v1956_v0 = vpop.f32.mrb[44].mxu0  ;;  %2042 = vmatprep.mubr.msk.f32.mxu1 %vm1013_vm0, %v985_v60 }
 0x14f   :  { %v1957_v62 = vpop.f32.mrb[45].mxu0 }
 0x150   :  { %v1958_v1 = vadd.f32 %v1957_v62, %v1956_v0  ;;  %v1959_v2 = vpop.f32.mrb[46].mxu0  ;;  %2043 = vmatmul.mubr.msk.f32.gmra.mrb[36].mxu1 %vm1013_vm0, %v986_v63 }
 0x151   :  { %v1960_v3 = vpop.f32.mrb[47].mxu0 }
 0x152   :  { %v943_v4 = vadd.f32 %v1958_v1, %v2573_v24  ;;  %v1961_v5 = vadd.f32 %v1960_v3, %v1959_v2 }
 0x154   :  { %v987_v6 = vmax.f32 %v943_v4, 0.0  ;;  %v946_v10 = vadd.f32 %v1961_v5, %v2575_v26 }
 0x156   :  { %v988_v8 = vmax.f32 %v946_v10, 0.0  ;;  %v1962_v11 = vpop.f32.mrb[48].mxu0  ;;  %2045 = vmatprep.mubr.msk.f32.mxu1 %vm1013_vm0, %v987_v6 }
 0x157   :  { %v1963_v12 = vpop.f32.mrb[49].mxu0 }
 0x158   :  { %v1964_v13 = vadd.f32 %v1963_v12, %v1962_v11  ;;  %v1965_v14 = vpop.f32.mrb[50].mxu0  ;;  %2046 = vmatmul.mubr.msk.f32.gmra.mrb[38].mxu1 %vm1013_vm0, %v988_v8 }
 0x159   :  { %v1966_v15 = vpop.f32.mrb[51].mxu0 }
 0x15a   :  { %v951_v16 = vadd.f32 %v1964_v13, %v2577_v39  ;;  %v1967_v17 = vadd.f32 %v1966_v15, %v1965_v14 }
 0x15c   :  { %v989_v18 = vmax.f32 %v951_v16, 0.0  ;;  %v954_v24 = vadd.f32 %v1967_v17, %v2579_v41 }
 0x15e   :  { %v990_v19 = vmax.f32 %v954_v24, 0.0  ;;  %v1968_v20 = vpop.f32.mrb[52].mxu0  ;;  %2056 = vmatprep.mubr.msk.f32.mxu1 %vm1013_vm0, %v989_v18 }
 0x15f   :  { %v1969_v26 = vpop.f32.mrb[53].mxu0 }
 0x160   :  { %v1970_v21 = vadd.f32 %v1969_v26, %v1968_v20  ;;  %v1971_v22 = vpop.f32.mrb[54].mxu0  ;;  %2057 = vmatmul.mubr.msk.f32.vlgmr.msra.gmra.mrb[40].mxu1 %vm1013_vm0, %v990_v19 }
 0x161   :  { %v1972_v25 = vpop.f32.mrb[55].mxu0 }
 0x162   :  { %v959_v28 = vadd.f32 %v1970_v21, %v2581_v55  ;;  %v1973_v29 = vadd.f32 %v1972_v25, %v1971_v22 }
 0x164   :  { %v991_v30 = vmax.f32 %v959_v28, 0.0  ;;  %v962_v39 = vadd.f32 %v1973_v29, %v2583_v57 }
 0x166   :  { %v992_v31 = vmax.f32 %v962_v39, 0.0  ;;  %v1974_v32 = vpop.f32.mrb[56].mxu0  ;;  %2059 = vmatprep.mubr.msk.f32.mxu1 %vm1013_vm0, %v991_v30 }
 0x167   :  { %v1975_v41 = vpop.f32.mrb[57].mxu0 }
 0x168   :  { %v1976_v33 = vadd.f32 %v1975_v41, %v1974_v32  ;;  %v1977_v35 = vpop.f32.mrb[58].mxu0  ;;  %2060 = vmatmul.mubr.msk.f32.gmra.mrb[42].mxu1 %vm1013_vm0, %v992_v31 }
 0x169   :  { %v1978_v36 = vpop.f32.mrb[59].mxu0 }
 0x16a   :  { %v967_v37 = vadd.f32 %v1976_v33, %v2585_v7  ;;  %v1979_v38 = vadd.f32 %v1978_v36, %v1977_v35 }
 0x16c   :  { %v993_v40 = vmax.f32 %v967_v37, 0.0  ;;  %v970_v55 = vadd.f32 %v1979_v38, %v2587_v9  ;;  %v1288_v9 = vld [vmem:[%s2678_s3] sm:$0xff] }
 0x16d   :  { %v2112_v52 = vpack.c.bf16 %v1289_v51, %v1288_v9 }
 0x16e   :  { %v994_v42 = vmax.f32 %v970_v55, 0.0  ;;  %v1980_v43 = vpop.f32.mrb[60].mxu0  ;;  %2062 = vmatprep.mubr.msk.f32.mxu1 %vm1013_vm0, %v993_v40 }
 0x16f   :  { %v1981_v57 = vpop.f32.mrb[61].mxu0  ;;  %2113 = vmatprep.subr.bf16.mxu1 %v2112_v52 }
 0x170   :  { %v1982_v44 = vadd.f32 %v1981_v57, %v1980_v43  ;;  %v1983_v45 = vpop.f32.mrb[62].mxu0  ;;  %2063 = vmatmul.mubr.msk.f32.gmra.mrb[44].mxu1 %vm1013_vm0, %v994_v42 }
 0x171   :  { %v1984_v47 = vpop.f32.mrb[63].mxu0  ;;  %2115 = vmatpush3.bf16.msra.mxu1 %v2112_v52 }
 0x172   :  { %v975_v46 = vadd.f32 %v1982_v44, %v2589_v23  ;;  %v1985_v49 = vadd.f32 %v1984_v47, %v1983_v45 }
 0x174   :  { %v995_v48 = vmax.f32 %v975_v46, 0.0  ;;  %v978_v7 = vadd.f32 %v1985_v49, %v2591_v27 }
 0x176   :  { %v996_v50 = vmax.f32 %v978_v7, 0.0  ;;  %2065 = vmatprep.mubr.msk.f32.mxu1 %vm1013_vm0, %v995_v48 }
 0x178   :  { %2066 = vmatmul.mubr.msk.f32.gmra.mrb[46].mxu1 %vm1013_vm0, %v996_v50 }
 0x213   :  { %v2038_v23 = vpop.f32.mrb[32].mxu1 }
 0x214   :  { %v1104_v53 = vpop.f32.mrb[33].mxu1  ;;  %v1273_v54 = vmax.f32 %v2038_v23, 0.0 }
 0x215   :  { %v1272_v27 = vmax.f32 %v1104_v53, 0.0 }
 0x217   :  { %2072 = vmatprep.mubr.msk.f32.mxu1 %vm1290_vm1, %v1272_v27 }
 0x218   :  { %2073 = vmatmul.mubr.msk.f32.vlgmr.msra.gmra.mrb[48].mxu1 %vm1290_vm1, %v1273_v54 }
 0x21b   :  { %v2041_v56 = vpop.f32.mrb[34].mxu1 }
 0x21c   :  { %v1114_v58 = vpop.f32.mrb[35].mxu1  ;;  %v1275_v59 = vmax.f32 %v2041_v56, 0.0 }
 0x21d   :  { %v1274_v34 = vmax.f32 %v1114_v58, 0.0 }
 0x21f   :  { %2075 = vmatprep.mubr.msk.f32.mxu1 %vm1290_vm1, %v1274_v34 }
 0x220   :  { %2076 = vmatmul.mubr.msk.f32.gmra.mrb[50].mxu1 %vm1290_vm1, %v1275_v59 }
 0x223   :  { %v2044_v60 = vpop.f32.mrb[36].mxu1 }
 0x224   :  { %v1124_v61 = vpop.f32.mrb[37].mxu1  ;;  %v1277_v0 = vmax.f32 %v2044_v60, 0.0 }
 0x225   :  { %v1276_v63 = vmax.f32 %v1124_v61, 0.0 }
 0x227   :  { %2078 = vmatprep.mubr.msk.f32.mxu1 %vm1290_vm1, %v1276_v63 }
 0x228   :  { %2079 = vmatmul.mubr.msk.f32.gmra.mrb[52].mxu1 %vm1290_vm1, %v1277_v0 }
 0x22b   :  { %v2047_v62 = vpop.f32.mrb[38].mxu1 }
 0x22c   :  { %v1134_v1 = vpop.f32.mrb[39].mxu1  ;;  %v1279_v3 = vmax.f32 %v2047_v62, 0.0 }
 0x22d   :  { %v1278_v2 = vmax.f32 %v1134_v1, 0.0 }
 0x22f   :  { %2081 = vmatprep.mubr.msk.f32.mxu1 %vm1290_vm1, %v1278_v2 }
 0x230   :  { %2082 = vmatmul.mubr.msk.f32.gmra.mrb[54].mxu1 %vm1290_vm1, %v1279_v3 }
 0x233   :  { %v2058_v4 = vpop.f32.mrb[40].mxu1 }
 0x234   :  { %v1233_v5 = vpop.f32.mrb[41].mxu1  ;;  %v1281_v10 = vmax.f32 %v2058_v4, 0.0 }
 0x235   :  { %v1280_v6 = vmax.f32 %v1233_v5, 0.0 }
 0x237   :  { %2084 = vmatprep.mubr.msk.f32.mxu1 %vm1290_vm1, %v1280_v6 }
 0x238   :  { %2085 = vmatmul.mubr.msk.f32.gmra.mrb[56].mxu1 %vm1290_vm1, %v1281_v10 }
 0x23b   :  { %v2061_v8 = vpop.f32.mrb[42].mxu1 }
 0x23c   :  { %v1243_v11 = vpop.f32.mrb[43].mxu1  ;;  %v1283_v13 = vmax.f32 %v2061_v8, 0.0 }
 0x23d   :  { %v1282_v12 = vmax.f32 %v1243_v11, 0.0 }
 0x23f   :  { %2087 = vmatprep.mubr.msk.f32.mxu1 %vm1290_vm1, %v1282_v12 }
 0x240   :  { %2088 = vmatmul.mubr.msk.f32.gmra.mrb[58].mxu1 %vm1290_vm1, %v1283_v13 }
 0x243   :  { %v2064_v14 = vpop.f32.mrb[44].mxu1 }
 0x244   :  { %v1253_v15 = vpop.f32.mrb[45].mxu1  ;;  %v1285_v17 = vmax.f32 %v2064_v14, 0.0 }
 0x245   :  { %v1284_v16 = vmax.f32 %v1253_v15, 0.0 }
 0x247   :  { %2090 = vmatprep.mubr.msk.f32.mxu1 %vm1290_vm1, %v1284_v16 }
 0x248   :  { %2091 = vmatmul.mubr.msk.f32.gmra.mrb[60].mxu1 %vm1290_vm1, %v1285_v17 }
 0x24b   :  { %v2067_v18 = vpop.f32.mrb[46].mxu1 }
 0x24c   :  { %v1263_v24 = vpop.f32.mrb[47].mxu1  ;;  %v1287_v20 = vmax.f32 %v2067_v18, 0.0 }
 0x24d   :  { %v1286_v19 = vmax.f32 %v1263_v24, 0.0 }
 0x24f   :  { %2093 = vmatprep.mubr.msk.f32.mxu1 %vm1290_vm1, %v1286_v19 }
 0x250   :  { %2094 = vmatmul.mubr.msk.f32.gmra.mrb[62].mxu1 %vm1290_vm1, %v1287_v20 }
 0x2eb   :  { %v2074_v26 = vpop.f32.mrb[48].mxu1 }
 0x2ec   :  { %v1405_v21 = vpop.f32.mrb[49].mxu1 }
 0x2ed   :  { %v1747_v22 = vpack.c.bf16 %v2074_v26, %v1405_v21 }
 0x2ef   :  { %1748 = vst [vmem:[%s2679_s4] sm:$0xff] %v1747_v22  }
 0x2f3   :  { %v2077_v25 = vpop.f32.mrb[50].mxu1 }
 0x2f4   :  { %v1415_v28 = vpop.f32.mrb[51].mxu1 }
 0x2f5   :  { %v1752_v29 = vpack.c.bf16 %v2077_v25, %v1415_v28 }
 0x2f7   :  { %1787 = vst [vmem:[%s2679_s4 + $0x8] sm:$0xff] %v1752_v29  }
 0x2fb   :  { %v2080_v30 = vpop.f32.mrb[52].mxu1 }
 0x2fc   :  { %v1425_v39 = vpop.f32.mrb[53].mxu1 }
 0x2fd   :  { %v1757_v31 = vpack.c.bf16 %v2080_v30, %v1425_v39 }
 0x2ff   :  { %1788 = vst [vmem:[%s2679_s4 + $0x10] sm:$0xff] %v1757_v31  }
 0x303   :  { %v2083_v32 = vpop.f32.mrb[54].mxu1 }
 0x304   :  { %v1435_v41 = vpop.f32.mrb[55].mxu1 }
 0x305   :  { %v1762_v33 = vpack.c.bf16 %v2083_v32, %v1435_v41 }
 0x307   :  { %1789 = vst [vmem:[%s2679_s4 + $0x18] sm:$0xff] %v1762_v33  }
 0x30b   :  { %v2086_v35 = vpop.f32.mrb[56].mxu1 }
 0x30c   :  { %v1445_v36 = vpop.f32.mrb[57].mxu1 }
 0x30d   :  { %v1767_v37 = vpack.c.bf16 %v2086_v35, %v1445_v36 }
 0x30f   :  { %1790 = vst [vmem:[%s2679_s4 + $0x20] sm:$0xff] %v1767_v37  }
 0x313   :  { %v2089_v38 = vpop.f32.mrb[58].mxu1 }
 0x314   :  { %v1455_v40 = vpop.f32.mrb[59].mxu1 }
 0x315   :  { %v1772_v55 = vpack.c.bf16 %v2089_v38, %v1455_v40 }
 0x317   :  { %1791 = vst [vmem:[%s2679_s4 + $0x28] sm:$0xff] %v1772_v55  }
 0x31b   :  { %v2092_v42 = vpop.f32.mrb[60].mxu1 }
 0x31c   :  { %v1465_v43 = vpop.f32.mrb[61].mxu1 }
 0x31d   :  { %v1777_v57 = vpack.c.bf16 %v2092_v42, %v1465_v43 }
 0x31f   :  { %1792 = vst [vmem:[%s2679_s4 + $0x30] sm:$0xff] %v1777_v57  }
 0x323   :  { %v2095_v44 = vpop.f32.mrb[62].mxu1 }
 0x324   :  { %v1475_v45 = vpop.f32.mrb[63].mxu1 }
 0x325   :  { %v1782_v47 = vpack.c.bf16 %v2095_v44, %v1475_v45 }
 0x327   :  { %1793 = vst [vmem:[%s2679_s4 + $0x38] sm:$0xff] %v1782_v47  }

</bundles_post_ra>
